<compile_context>
chip_gen: v7x
topology: tpu7x:2x2x1
jax: 0.10.0
libtpu: 0.0.40
codegen_flags: <defaults>
</compile_context>

<pallas_src>
import functools

import jax
import jax.numpy as jnp
from jax.experimental import pallas as pl
from jax.experimental.pallas import tpu as pltpu

BN_EPS = 1e-5


def _attention_kernel(enc_out_ref, enc_att_ref, dec_sum_ref,
                      bn_ref, w1_ref, b1_ref, w2_ref,
                      alpha_ref, out_ref, *, use_bf16_matmul=False):
    # Block shapes:
    #   enc_out_ref : (TB, L, E)   enc_att_ref : (TB, L, A)
    #   dec_sum_ref : (TB, 1, A)
    #   bn_ref      : (4, L, 1)  rows = [scale1, shift1, scale2, logit_shift]
    #   w1_ref      : (A, A)       b1_ref : (1, A)     w2_ref : (1, A)
    enc_att = enc_att_ref[...]
    dec_sum = dec_sum_ref[...]
    bn = bn_ref[...]

    # ReLU -> BatchNorm1d(num_loc) #1 (eval mode: per-location scale/shift).
    x = jnp.maximum(enc_att + dec_sum, 0.0)
    x = x * bn[0] + bn[1]                                     # (TB, L, A)

    tb, L, A = x.shape
    x2d = x.reshape(tb * L, A)                                # one big MXU matmul
    w1 = w1_ref[...]
    if use_bf16_matmul:
        x2d = x2d.astype(jnp.bfloat16)
        w1 = w1.astype(jnp.bfloat16)
    h = jnp.dot(x2d, w1, preferred_element_type=jnp.float32) + b1_ref[...]
    h = jnp.maximum(h, 0.0).reshape(tb, L, A)                 # ReLU

    # BN#2 + Linear(A->1) folded: logits = s2_l * sum_a(ReLU(h)*w2_a) + shift_l
    z = jnp.sum(h * w2_ref[...], axis=-1)                     # (TB, L) lane reduce
    logits = z * bn[2][:, 0] + bn[3][:, 0]                    # per-location FMA

    # softmax over locations (lane axis); b2 dropped (shift-invariant).
    m = jnp.max(logits, axis=-1, keepdims=True)
    e = jnp.exp(logits - m)
    alpha = e * pl.reciprocal(jnp.sum(e, axis=-1, keepdims=True), approx=False)

    alpha3 = alpha[:, None, :]                                # (TB, 1, L) lane-dense
    alpha_ref[...] = alpha3

    # attention weighted encoding on the MXU: (TB,1,L) @ (TB,L,E) -> (TB,1,E)
    out_ref[...] = jnp.einsum('tql,tle->tqe', alpha3, enc_out_ref[...],
                              preferred_element_type=jnp.float32)


def _choose_tile_b(B, L, E, A, itemsize=4, vmem_budget_bytes=8 << 20):
    """Largest divisor of B whose double-buffered working set fits the budget,
    preferring >= 2 grid steps so both TensorCores (v7x) get work."""
    best = 1
    for t in range(1, B + 1):
        if B % t:
            continue
        per_tile = t * (L * E + L * A + A + L + E) * itemsize
        if 2 * per_tile <= vmem_budget_bytes:
            best = t
    if best == B and B > 1:
        for t in range(B - 1, 0, -1):
            if B % t == 0:
                best = t
                break
    return best


def attention_forward(encoder_output, encoder_att, decoder_state, params,
                      *, tile_b=None, use_bf16_matmul=False):
    """Pallas implementation of Attention.forward (eval mode)."""
    B, L, E = encoder_output.shape
    A = encoder_att.shape[-1]
    num_layers = decoder_state.shape[0]

    # Hoisted decoder projection: sum_l Linear(D->A)(decoder_state[l]) as one XLA matmul.
    dec_sum = (jnp.einsum('nbd,ad->ba', decoder_state, params["wd"])
               + num_layers * params["bd"])                    # (B, A)
    dec_sum = dec_sum[:, None, :].astype(jnp.float32)          # (B, 1, A)

    # BatchNorm1d(num_loc) eval mode folded to per-location scale/shift.
    def scale_shift(g, be, m, v):
        s = g / jnp.sqrt(v + BN_EPS)
        return s, be - m * s
    s1, sh1 = scale_shift(params["bn1_gamma"], params["bn1_beta"],
                          params["bn1_mean"], params["bn1_var"])
    s2, sh2 = scale_shift(params["bn2_gamma"], params["bn2_beta"],
                          params["bn2_mean"], params["bn2_var"])
    # Fold BN#2 through Linear(A->1): logits = s2_l * (ReLU(h) . w2) + sh2_l * sum(w2)
    w2_row = params["w2"].reshape(1, A).astype(jnp.float32)    # b2 dropped (softmax shift)
    logit_shift = sh2 * jnp.sum(params["w2"])                  # (L,)
    bn = jnp.stack([s1, sh1, s2, logit_shift]).reshape(4, L, 1).astype(jnp.float32)

    w1_t = params["w1"].T.astype(jnp.float32)                  # (A, A)
    b1 = params["b1"].reshape(1, A).astype(jnp.float32)

    if tile_b is None:
        tile_b = _choose_tile_b(B, L, E, A)
    assert B % tile_b == 0, "tile_b must divide the batch size"
    grid = (B // tile_b,)

    def full_spec(shape):
        n = len(shape)
        return pl.BlockSpec(shape, lambda g: (0,) * n)

    kernel = functools.partial(_attention_kernel, use_bf16_matmul=use_bf16_matmul)

    alpha3, out3 = pl.pallas_call(
        kernel,
        out_shape=(
            jax.ShapeDtypeStruct((B, 1, L), jnp.float32),
            jax.ShapeDtypeStruct((B, 1, E), jnp.float32),
        ),
        grid_spec=pltpu.PrefetchScalarGridSpec(
            num_scalar_prefetch=0,
            grid=grid,
            in_specs=[
                pl.BlockSpec((tile_b, L, E), lambda g: (g, 0, 0)),   # encoder_output
                pl.BlockSpec((tile_b, L, A), lambda g: (g, 0, 0)),   # encoder_att
                pl.BlockSpec((tile_b, 1, A), lambda g: (g, 0, 0)),   # hoisted decoder proj
                full_spec((4, L, 1)),                                # BN scale/shift (packed)
                full_spec((A, A)),                                   # W1^T
                full_spec((1, A)),                                   # b1
                full_spec((1, A)),                                   # w2 row
            ],
            out_specs=[
                pl.BlockSpec((tile_b, 1, L), lambda g: (g, 0, 0)),   # alpha (lane-dense)
                pl.BlockSpec((tile_b, 1, E), lambda g: (g, 0, 0)),   # attention_output
            ],
        ),
        compiler_params=pltpu.CompilerParams(
            dimension_semantics=("parallel",)),
    )(encoder_output.astype(jnp.float32), encoder_att.astype(jnp.float32),
      dec_sum, bn, w1_t, b1, w2_row)

    alpha = alpha3.reshape(B, L, 1)
    attention_output = out3.reshape(B, E)
    return alpha, attention_output


def _reference_forward(encoder_output, encoder_att, decoder_state, params):
    """Plain JAX reference mirroring the PyTorch forward (eval mode)."""
    dec_att = decoder_state @ params["wd"].T + params["bd"]           # (num_layers, B, A)
    dec_att = dec_att[:, :, None, :]                                  # unsqueeze(2)
    x = encoder_att + jnp.sum(dec_att, axis=0)                        # (B, L, A)

    def bn(x, g, b, m, v):
        return (x - m[None, :, None]) / jnp.sqrt(v[None, :, None] + BN_EPS) \
               * g[None, :, None] + b[None, :, None]

    x = jnp.maximum(x, 0.0)
    x = bn(x, params["bn1_gamma"], params["bn1_beta"], params["bn1_mean"], params["bn1_var"])
    x = x @ params["w1"].T + params["b1"]
    x = jnp.maximum(x, 0.0)
    x = bn(x, params["bn2_gamma"], params["bn2_beta"], params["bn2_mean"], params["bn2_var"])
    full_att = x @ params["w2"].T + params["b2"]                      # (B, L, 1)
    alpha = jax.nn.softmax(full_att, axis=1)
    attention_output = jnp.sum(alpha * encoder_output, axis=1)        # (B, E)
    return alpha, attention_output


def _init_params(key, num_loc, encoder_dim, decoder_dim, attention_dim):
    ks = jax.random.split(key, 14)
    u = lambda k, shape, bound: jax.random.uniform(k, shape, jnp.float32, -bound, bound)
    D, A, L = decoder_dim, attention_dim, num_loc
    params = {
        # decoder_attention: Linear(decoder_dim, attention_dim)
        "wd": u(ks[0], (A, D), 1.0 / (D ** 0.5)),
        "bd": u(ks[1], (A,), 1.0 / (D ** 0.5)),
        # full_attention[3]: Linear(attention_dim, attention_dim)
        "w1": u(ks[2], (A, A), 1.0 / (A ** 0.5)),
        "b1": u(ks[3], (A,), 1.0 / (A ** 0.5)),
        # full_attention[7]: Linear(attention_dim, 1)
        "w2": u(ks[4], (1, A), 1.0 / (A ** 0.5)),
        "b2": u(ks[5], (1,), 1.0 / (A ** 0.5)),
        # BatchNorm1d(num_loc) x2 -- eval-mode stats + affine params
        "bn1_gamma": 1.0 + 0.1 * jax.random.normal(ks[6], (L,), jnp.float32),
        "bn1_beta": 0.1 * jax.random.normal(ks[7], (L,), jnp.float32),
        "bn1_mean": 0.05 * jax.random.normal(ks[8], (L,), jnp.float32),
        "bn1_var": jnp.abs(1.0 + 0.1 * jax.random.normal(ks[9], (L,), jnp.float32)),
        "bn2_gamma": 1.0 + 0.1 * jax.random.normal(ks[10], (L,), jnp.float32),
        "bn2_beta": 0.1 * jax.random.normal(ks[11], (L,), jnp.float32),
        "bn2_mean": 0.05 * jax.random.normal(ks[12], (L,), jnp.float32),
        "bn2_var": jnp.abs(1.0 + 0.1 * jax.random.normal(ks[13], (L,), jnp.float32)),
    }
    # NOTE: encoder_attention Linear is not used in forward() (only in
    # generate_encoder_atts); encoder_att is supplied as an input instead.
    return params


if __name__ == "__main__":
    # Small shapes consistent with the module's forward signature.
    B, L, E, D, A, NUM_LAYERS = 8, 16, 64, 32, 32, 2
    DROPOUT_P = 0.1  # identity in eval mode

    key = jax.random.PRNGKey(0)
    k_in, k_p = jax.random.split(key)
    k1, k2, k3 = jax.random.split(k_in, 3)

    encoder_output = jax.random.normal(k1, (B, L, E), jnp.float32)
    encoder_att = jax.random.normal(k2, (B, L, A), jnp.float32)
    decoder_state = jax.random.normal(k3, (NUM_LAYERS, B, D), jnp.float32)

    params = _init_params(k_p, L, E, D, A)

    alpha, attn_out = attention_forward(encoder_output, encoder_att, decoder_state, params)
    jax.block_until_ready((alpha, attn_out))

    alpha_ref, attn_ref = _reference_forward(encoder_output, encoder_att, decoder_state, params)
    assert alpha.shape == (B, L, 1) and attn_out.shape == (B, E)
    assert jnp.allclose(alpha, alpha_ref, atol=1e-4, rtol=1e-4)
    assert jnp.allclose(attn_out, attn_ref, atol=1e-4, rtol=1e-4)

    print("KERNEL_OK")
</pallas_src>

<mosaic_0001>
module attributes {stable_mosaic.version = 11 : i64} {
  func.func @_attention_kernel(%arg0: i32, %arg1: memref<4x16x64xf32, #tpu.memory_space<vmem>>, %arg2: memref<4x16x32xf32, #tpu.memory_space<vmem>>, %arg3: memref<4x1x32xf32, #tpu.memory_space<vmem>>, %arg4: memref<4x16x1xf32, #tpu.memory_space<vmem>>, %arg5: memref<32x32xf32, #tpu.memory_space<vmem>>, %arg6: memref<1x32xf32, #tpu.memory_space<vmem>>, %arg7: memref<1x32xf32, #tpu.memory_space<vmem>>, %arg8: memref<4x1x16xf32, #tpu.memory_space<vmem>>, %arg9: memref<4x1x64xf32, #tpu.memory_space<vmem>>) attributes {dimension_semantics = [#tpu.dimension_semantics<parallel>], iteration_bounds = array<i64: 2>, scalar_prefetch = 0 : i64, scratch_operands = 0 : i64, tpu.core_type = #tpu.core_type<tc>, window_params = [{transform_indices = @transform_0, window_bounds = array<i64: 4, 16, 64>}, {transform_indices = @transform_1, window_bounds = array<i64: 4, 16, 32>}, {transform_indices = @transform_2, window_bounds = array<i64: 4, 1, 32>}, {pipeline_mode = #tpu.pipeline_mode<synchronous>, transform_indices = @transform_3, window_bounds = array<i64: 4, 16, 1>}, {pipeline_mode = #tpu.pipeline_mode<synchronous>, transform_indices = @transform_4, window_bounds = array<i64: 32, 32>}, {pipeline_mode = #tpu.pipeline_mode<synchronous>, transform_indices = @transform_5, window_bounds = array<i64: 1, 32>}, {pipeline_mode = #tpu.pipeline_mode<synchronous>, transform_indices = @transform_6, window_bounds = array<i64: 1, 32>}, {transform_indices = @transform_7, window_bounds = array<i64: 4, 1, 16>}, {transform_indices = @transform_8, window_bounds = array<i64: 4, 1, 64>}]} {
    %c0 = arith.constant 0 : index
    %c0_0 = arith.constant 0 : index
    %c0_1 = arith.constant 0 : index
    %0 = vector.load %arg2[%c0, %c0_0, %c0_1] : memref<4x16x32xf32, #tpu.memory_space<vmem>>, vector<4x16x32xf32>
    %c0_2 = arith.constant 0 : index
    %c0_3 = arith.constant 0 : index
    %c0_4 = arith.constant 0 : index
    %1 = vector.load %arg3[%c0_2, %c0_3, %c0_4] : memref<4x1x32xf32, #tpu.memory_space<vmem>>, vector<4x1x32xf32>
    %c0_5 = arith.constant 0 : index
    %c0_6 = arith.constant 0 : index
    %c0_7 = arith.constant 0 : index
    %2 = vector.load %arg4[%c0_5, %c0_6, %c0_7] : memref<4x16x1xf32, #tpu.memory_space<vmem>>, vector<4x16x1xf32>
    %3 = vector.broadcast %1 : vector<4x1x32xf32> to vector<4x16x32xf32>
    %4 = arith.addf %0, %3 : vector<4x16x32xf32>
    %cst = arith.constant 0.000000e+00 : f32
    %5 = vector.broadcast %cst : f32 to vector<4x16x32xf32>
    %6 = arith.maximumf %4, %5 : vector<4x16x32xf32>
    %7 = vector.extract_strided_slice %2 {offsets = [0, 0, 0], sizes = [1, 16, 1], strides = [1, 1, 1]} : vector<4x16x1xf32> to vector<1x16x1xf32>
    %8 = vector.shape_cast %7 : vector<1x16x1xf32> to vector<16x1xf32>
    %9 = vector.shape_cast %8 : vector<16x1xf32> to vector<1x16x1xf32>
    %10 = vector.broadcast %9 : vector<1x16x1xf32> to vector<4x16x32xf32>
    %11 = arith.mulf %6, %10 : vector<4x16x32xf32>
    %12 = vector.extract_strided_slice %2 {offsets = [1, 0, 0], sizes = [1, 16, 1], strides = [1, 1, 1]} : vector<4x16x1xf32> to vector<1x16x1xf32>
    %13 = vector.shape_cast %12 : vector<1x16x1xf32> to vector<16x1xf32>
    %14 = vector.shape_cast %13 : vector<16x1xf32> to vector<1x16x1xf32>
    %15 = vector.broadcast %14 : vector<1x16x1xf32> to vector<4x16x32xf32>
    %16 = arith.addf %11, %15 : vector<4x16x32xf32>
    %17 = vector.shape_cast %16 : vector<4x16x32xf32> to vector<64x32xf32>
    %c0_8 = arith.constant 0 : index
    %c0_9 = arith.constant 0 : index
    %18 = vector.load %arg5[%c0_8, %c0_9] : memref<32x32xf32, #tpu.memory_space<vmem>>, vector<32x32xf32>
    %cst_10 = arith.constant dense<0.000000e+00> : vector<64x32xf32>
    %19 = tpu.matmul %17, %18, %cst_10 {dimension_numbers = #tpu.dot_dimension_numbers<[1], [0], [0], [1], [0, 0, 1, 1], [], []>} : vector<64x32xf32>, vector<32x32xf32>, vector<64x32xf32> -> vector<64x32xf32>
    %c0_11 = arith.constant 0 : index
    %c0_12 = arith.constant 0 : index
    %20 = vector.load %arg6[%c0_11, %c0_12] : memref<1x32xf32, #tpu.memory_space<vmem>>, vector<1x32xf32>
    %21 = vector.broadcast %20 : vector<1x32xf32> to vector<64x32xf32>
    %22 = arith.addf %19, %21 : vector<64x32xf32>
    %cst_13 = arith.constant 0.000000e+00 : f32
    %23 = vector.broadcast %cst_13 : f32 to vector<64x32xf32>
    %24 = arith.maximumf %22, %23 : vector<64x32xf32>
    %25 = vector.shape_cast %24 : vector<64x32xf32> to vector<4x16x32xf32>
    %c0_14 = arith.constant 0 : index
    %c0_15 = arith.constant 0 : index
    %26 = vector.load %arg7[%c0_14, %c0_15] : memref<1x32xf32, #tpu.memory_space<vmem>>, vector<1x32xf32>
    %27 = vector.shape_cast %26 : vector<1x32xf32> to vector<1x1x32xf32>
    %28 = vector.broadcast %27 : vector<1x1x32xf32> to vector<4x16x32xf32>
    %29 = arith.mulf %25, %28 : vector<4x16x32xf32>
    %cst_16 = arith.constant dense<0.000000e+00> : vector<4x16xf32>
    %30 = vector.multi_reduction <add>, %29, %cst_16 [2] : vector<4x16x32xf32> to vector<4x16xf32>
    %31 = vector.extract_strided_slice %2 {offsets = [2, 0, 0], sizes = [1, 16, 1], strides = [1, 1, 1]} : vector<4x16x1xf32> to vector<1x16x1xf32>
    %32 = vector.shape_cast %31 : vector<1x16x1xf32> to vector<16x1xf32>
    %33 = vector.shape_cast %32 : vector<16x1xf32> to vector<16xf32>
    %34 = vector.shape_cast %33 : vector<16xf32> to vector<1x16xf32>
    %35 = vector.broadcast %34 : vector<1x16xf32> to vector<4x16xf32>
    %36 = arith.mulf %30, %35 : vector<4x16xf32>
    %37 = vector.extract_strided_slice %2 {offsets = [3, 0, 0], sizes = [1, 16, 1], strides = [1, 1, 1]} : vector<4x16x1xf32> to vector<1x16x1xf32>
    %38 = vector.shape_cast %37 : vector<1x16x1xf32> to vector<16x1xf32>
    %39 = vector.shape_cast %38 : vector<16x1xf32> to vector<16xf32>
    %40 = vector.shape_cast %39 : vector<16xf32> to vector<1x16xf32>
    %41 = vector.broadcast %40 : vector<1x16xf32> to vector<4x16xf32>
    %42 = arith.addf %36, %41 : vector<4x16xf32>
    %cst_17 = arith.constant dense<0xFF800000> : vector<4xf32>
    %43 = vector.multi_reduction <maximumf>, %42, %cst_17 [1] : vector<4x16xf32> to vector<4xf32>
    %44 = vector.shape_cast %43 : vector<4xf32> to vector<4x1xf32>
    %45 = vector.broadcast %44 : vector<4x1xf32> to vector<4x16xf32>
    %46 = arith.subf %42, %45 : vector<4x16xf32>
    %47 = math.exp %46 : vector<4x16xf32>
    %cst_18 = arith.constant dense<0.000000e+00> : vector<4xf32>
    %48 = vector.multi_reduction <add>, %47, %cst_18 [1] : vector<4x16xf32> to vector<4xf32>
    %49 = vector.shape_cast %48 : vector<4xf32> to vector<4x1xf32>
    %50 = tpu.reciprocal %49 : vector<4x1xf32> -> vector<4x1xf32>
    %51 = vector.broadcast %50 : vector<4x1xf32> to vector<4x16xf32>
    %52 = arith.mulf %47, %51 : vector<4x16xf32>
    %53 = vector.shape_cast %52 : vector<4x16xf32> to vector<4x1x16xf32>
    %c0_19 = arith.constant 0 : index
    %c0_20 = arith.constant 0 : index
    %c0_21 = arith.constant 0 : index
    %54 = vector.load %arg8[%c0_19, %c0_20, %c0_21] : memref<4x1x16xf32, #tpu.memory_space<vmem>>, vector<4x1x16xf32>
    tpu.vector_store %arg8[%c0_19, %c0_20, %c0_21], %53 {strides = array<i32>} : memref<4x1x16xf32, #tpu.memory_space<vmem>>, vector<4x1x16xf32>,
    %c0_22 = arith.constant 0 : index
    %c0_23 = arith.constant 0 : index
    %c0_24 = arith.constant 0 : index
    %55 = vector.load %arg1[%c0_22, %c0_23, %c0_24] : memref<4x16x64xf32, #tpu.memory_space<vmem>>, vector<4x16x64xf32>
    "tpu.trace_start"() <{level = 10 : i32, message = "tql,tle->tqe"}> : () -> ()
    %cst_25 = arith.constant dense<0.000000e+00> : vector<4x1x64xf32>
    %56 = tpu.matmul %53, %55, %cst_25 {dimension_numbers = #tpu.dot_dimension_numbers<[2], [1], [1], [2], [0, 0, 0, 1, 1, 2], [0], [0]>} : vector<4x1x16xf32>, vector<4x16x64xf32>, vector<4x1x64xf32> -> vector<4x1x64xf32>
    "tpu.trace_stop"() : () -> ()
    %c0_26 = arith.constant 0 : index
    %c0_27 = arith.constant 0 : index
    %c0_28 = arith.constant 0 : index
    %57 = vector.load %arg9[%c0_26, %c0_27, %c0_28] : memref<4x1x64xf32, #tpu.memory_space<vmem>>, vector<4x1x64xf32>
    tpu.vector_store %arg9[%c0_26, %c0_27, %c0_28], %56 {strides = array<i32>} : memref<4x1x64xf32, #tpu.memory_space<vmem>>, vector<4x1x64xf32>,
    return
  }
  func.func @transform_0(%arg0: i32) -> (i32, i32, i32) {
    %c0_i32 = arith.constant 0 : i32
    %c0_i32_0 = arith.constant 0 : i32
    %c0_i32_1 = arith.constant 0 : i32
    return %arg0, %c0_i32, %c0_i32_0 : i32, i32, i32
  }
  func.func @transform_1(%arg0: i32) -> (i32, i32, i32) {
    %c0_i32 = arith.constant 0 : i32
    %c0_i32_0 = arith.constant 0 : i32
    %c0_i32_1 = arith.constant 0 : i32
    return %arg0, %c0_i32, %c0_i32_0 : i32, i32, i32
  }
  func.func @transform_2(%arg0: i32) -> (i32, i32, i32) {
    %c0_i32 = arith.constant 0 : i32
    %c0_i32_0 = arith.constant 0 : i32
    %c0_i32_1 = arith.constant 0 : i32
    return %arg0, %c0_i32, %c0_i32_0 : i32, i32, i32
  }
  func.func @transform_3(%arg0: i32) -> (i32, i32, i32) {
    %c0_i32 = arith.constant 0 : i32
    %c0_i32_0 = arith.constant 0 : i32
    %c0_i32_1 = arith.constant 0 : i32
    %c0_i32_2 = arith.constant 0 : i32
    return %c0_i32, %c0_i32_0, %c0_i32_1 : i32, i32, i32
  }
  func.func @transform_4(%arg0: i32) -> (i32, i32) {
    %c0_i32 = arith.constant 0 : i32
    %c0_i32_0 = arith.constant 0 : i32
    %c0_i32_1 = arith.constant 0 : i32
    return %c0_i32, %c0_i32_0 : i32, i32
  }
  func.func @transform_5(%arg0: i32) -> (i32, i32) {
    %c0_i32 = arith.constant 0 : i32
    %c0_i32_0 = arith.constant 0 : i32
    %c0_i32_1 = arith.constant 0 : i32
    return %c0_i32, %c0_i32_0 : i32, i32
  }
  func.func @transform_6(%arg0: i32) -> (i32, i32) {
    %c0_i32 = arith.constant 0 : i32
    %c0_i32_0 = arith.constant 0 : i32
    %c0_i32_1 = arith.constant 0 : i32
    return %c0_i32, %c0_i32_0 : i32, i32
  }
  func.func @transform_7(%arg0: i32) -> (i32, i32, i32) {
    %c0_i32 = arith.constant 0 : i32
    %c0_i32_0 = arith.constant 0 : i32
    %c0_i32_1 = arith.constant 0 : i32
    return %arg0, %c0_i32, %c0_i32_0 : i32, i32, i32
  }
  func.func @transform_8(%arg0: i32) -> (i32, i32, i32) {
    %c0_i32 = arith.constant 0 : i32
    %c0_i32_0 = arith.constant 0 : i32
    %c0_i32_1 = arith.constant 0 : i32
    return %arg0, %c0_i32, %c0_i32_0 : i32, i32, i32
  }
}

</mosaic_0001>

<bundles_post_ra>
// kernel: tpu_custom_call.1
= control target key start
LH: loop header
LB: loop body
LE: loop exit
PB: predicated region body
PF: predicated region fallthrough
CT: control target
= control target key end

     0   :  { %s2408_s0 = inlined_call_operand.hbm [shape: f32[8,16,64], index: 0, kind: input, shape index: {}]   ;;  %s2409_s1 = inlined_call_operand.hbm [shape: f32[8,16,32], index: 1, kind: input, shape index: {}]   ;;  %s2410_s2 = inlined_call_operand.vmem [shape: f32[8,1,32], index: 2, kind: input, shape index: {}]   ;;  %s2411_s3 = inlined_call_operand.vmem [shape: f32[4,16,1], index: 3, kind: input, shape index: {}]   ;;  %s2412_s4 = inlined_call_operand.vmem [shape: f32[32,32], index: 4, kind: input, shape index: {}]   ;;  %s2413_s5 = inlined_call_operand.vmem [shape: f32[1,32], index: 5, kind: input, shape index: {}]   ;;  %s2414_s6 = inlined_call_operand.vmem [shape: f32[1,32], index: 6, kind: input, shape index: {}]   ;;  %s2415_s7 = inlined_call_operand.hbm [shape: f32[8,1,16], index: 7, kind: output, shape index: {0}]   ;;  %s2416_s8 = inlined_call_operand.hbm [shape: f32[8,1,64], index: 8, kind: output, shape index: {1}]  }
   0x1   :  { %2423 = sst [smem:[#allocation16_spill]] %s2408_s0 }
   0x2   :  { %14 = vsyncpa [#allocation3], 0 }
   0x3   :  { %16 = vsyncpa [#allocation3 + $0x1], 0 }
   0x4   :  { %17 = vsyncpa [#allocation6], 0 }
   0x5   :  { %19 = vsyncpa [#allocation6 + $0x1], 0 }
   0x6   :  { %20 = vsyncpa [#allocation4], 0 }
   0x7   :  { %22 = vsyncpa [#allocation4 + $0x1], 0 }
   0x8   :  { %23 = vsyncpa [#allocation9], 0 }
   0x9   :  { %25 = vsyncpa [#allocation9 + $0x1], 0  ;;  %s1930_s27 = smov 0   ;;  %s1932_s28 = smov 0  }
   0xa   :  { %s1934_s29 = smov 0   ;;  %s1936_s30 = smov 0  }
   0xb LB: > { %2424 = sst [smem:[#allocation14_spill]] %s1867_s29  ;;  %s1951_s9 = sadd.s32 4294967295, %s1871_s30   ;;  %s1871_s30 = sphi %s1936_s30, %s2444_s30   ;;  %s1867_s29 = sphi %s1934_s29, %s2441_s29   ;;  %s1863_s28 = sphi %s1932_s28, %s2443_s28   ;;  %s1859_s27 = sphi %s1930_s27, %s2442_s27  }
   0xc   : > { %s1484_s10 = sadd.s32 4294967294, %s1871_s30   ;;  %s1955_s11 = sadd.s32 1, %s1871_s30  }
   0xd   : > { %s38_s12 = sadd.s32 1, %s1867_s29  ;;  %s35_s13 = ssub.s32 %s1871_s30, %s1955_s11 }
   0xe   : > { %p45_p0 = scmp.ne.s32.totalorder %s1867_s29, %s1863_s28  ;;  %p36_p1 = scmp.eq.s32.totalorder %s35_s13, 0 }
   0xf   : > { %p46_p2 = scmp.eq.s32.totalorder %s1871_s30, 0  ;;  %p51_p3 = scmp.ne.s32.totalorder %s1863_s28, %s1859_s27 }
  0x10   : > { %p52_p4 = scmp.eq.s32.totalorder %s1951_s9, 0  ;;  %p211_p7 = scmp.eq.s32.totalorder %s1951_s9, 1 }
  0x11   : > { %s1967_s14 = scalar_select %p36_p1, %s1867_s29, %s38_s12  }
  0x12   : > { %p1969_p5 = por %p46_p2, %p45_p0  ;;  %p1973_p6 = por %p52_p4, %p51_p3 }
  0x13   : > { %2425 = sst [smem:[#allocation15_spill]] %s1967_s14  ;;  %p217_p8 = scmp.eq.s32.totalorder %s1484_s10, 1 }
  0x14   : > { %s2427_s16 = scalar_select %p1973_p6, 1, 0 }
  0x15   : > { %p1647_p10 = scmp.lt.s32.totalorder %s1871_s30, 2  ;;  %p1980_p11 = por %p211_p7, %p45_p0 }
  0x16   : > { %p1984_p12 = por %p217_p8, %p51_p3  ;;  %s1989_s19 = sand.u32 1, %s1867_s29  }
  0x17   : > { %s2428_s17 = scalar_select %p1980_p11, 1, 0 }
  0x18   : > { %s2429_s18 = scalar_select %p1984_p12, 1, 0 }
  0x19   : > { %s2418_s20 = sshll.u32 %s1871_s30, 10  ;;  %s2417_s21 = sshll.u32 %s1989_s19, 6 }
  0x1a   : > { %s2430_s0 = sld [smem:[#allocation16_spill]]  ;;  %s279_s25 = scalar_lea.vmem [#allocation2], %s2417_s21 }
  0x1b   : > { %s287_s26 = sshll.u32 %s279_s25, 4  ;;  %p2004_p13 = pnand %p1647_p10, %p1969_p5  ;;  %s2008_s26 = int_to_ptr.vmem [resolvable:$true] %s287_s26 }
  0x1c   : > { %s276_s12 = scalar_lea.sflag [#allocation3], %s1989_s19 }
  0x1d   : > { %p1711_p1 = pneg %p2004_p13 }
  0x20   : > { %s1998_s24 = scalar_lea.hbm %s2430_s0, %s2418_s20  ;;  %s1714_s15 = scalar_lea.hbm %s2430_s0, 2048 }
  0x21   : > { %s1709_s13 = scalar_lea.hbm %s1998_s24, 1024  ;;  %p1715_p4 = scmp.lt.u32.totalorder %s1998_s24, %s2430_s0 }
  0x22   : > { %p1710_p0 = scmp.ne.s32.totalorder %s1998_s24, %s1709_s13  ;;  %p1716_p5 = scmp.lt.u32.totalorder %s1714_s15, %s1709_s13 }
  0x23   : > { %p1718_p8 = scmp.lt.u32.totalorder %s1709_s13, %s1998_s24 }
  0x24   : > { %p1712_p2 = pnand %p1711_p1, %p1710_p0  ;;  %p1717_p7 = por %p1716_p5, %p1715_p4 }
  0x26   : > { %p1713_p3 = pneg %p1712_p2  ;;  %p1719_p10 = por %p1718_p8, %p1717_p7 }
  0x28   : > { %p1720_p9 = pnand %p1719_p10, %p1713_p3 }
  0x2a   : > { %1723 = shalt.err (!%p1720_p9)
}
  0x2b   : > { %s1724_s20 = scalar_lea.vmem %s2008_s26, 1024  ;;  %s1873_s22 = smov [#allocation2]  }
  0x2c   : > { %p1725_p0 = scmp.ne.s32.totalorder %s2008_s26, %s1724_s20  ;;  %s1729_s23 = sshll.u32 %s1873_s22, 4  ;;  %s1730_s23 = int_to_ptr.vmem [resolvable:$false] %s1729_s23 }
  0x2d   : > { %s1731_s21 = scalar_lea.vmem %s1730_s23, 2048  ;;  %p1732_p11 = scmp.lt.s32.totalorder %s2008_s26, %s1730_s23 }
  0x2e   : > { %p1727_p2 = pnand %p1725_p0, %p1711_p1  ;;  %p1733_p4 = scmp.lt.s32.totalorder %s1731_s21, %s1724_s20 }
  0x30   : > { %p1728_p12 = pneg %p1727_p2  ;;  %p1734_p5 = por %p1733_p4, %p1732_p11 }
  0x32   : > { %p1735_p7 = pnand %p1734_p5, %p1728_p12 }
  0x34   : > { %1738 = shalt.err (!%p1735_p7)
}
  0x35   : > { %s2421_s13 = smov 128   ;;  %s1875_s15 = smov 8  }
  0x36   : > { %1636 = dma.hbm_to_vmem [thread:$0]  (!%p2004_p13), %s1998_s24, 1024, %s2008_s26, %s276_s12, %s2421_s13, %s2421_s13, %s1875_s15  }
  0x37   : > { %p1495_p9 = scmp.ge.s32.totalorder %s1871_s30, 1  ;;  %p325_p11 = scmp.lt.s32.totalorder %s1871_s30, 3 }
  0x38   : > { %s2433_s25 = sshll.u32 %s1871_s30, 10  ;;  %s2434_s0 = sshll.u32 %s1989_s19, 6 }
  0x39   : > { %p2043_p12 = pnand %p1495_p9, %p325_p11  ;;  %s2052_s21 = scalar_lea.hbm %s2409_s1, %s2433_s25 }
  0x3a   : > { %s301_s14 = scalar_lea.vmem [#allocation5], %s2434_s0  ;;  %s298_s24 = scalar_lea.sflag [#allocation6], %s1989_s19 }
  0x3b   : > { %s309_s29 = sshll.u32 %s301_s14, 4  ;;  %s1739_s26 = scalar_lea.hbm %s2052_s21, 1024  ;;  %s2056_s29 = int_to_ptr.vmem [resolvable:$true] %s309_s29 }
  0x3c   : > { %p1740_p3 = scmp.ne.s32.totalorder %s2052_s21, %s1739_s26  ;;  %s1744_s25 = scalar_lea.hbm %s2409_s1, 2048 }
  0x3d   : > { %p1745_p0 = scmp.lt.u32.totalorder %s2052_s21, %s2409_s1  ;;  %p1746_p2 = scmp.lt.u32.totalorder %s1744_s25, %s1739_s26 }
  0x3e   : > { %p1742_p8 = pnand %p1740_p3, %p1711_p1  ;;  %p1748_p5 = scmp.lt.u32.totalorder %s1739_s26, %s2052_s21 }
  0x3f   : > { %p1747_p4 = por %p1746_p2, %p1745_p0 }
  0x40   : > { %p1743_p10 = pneg %p1742_p8 }
  0x41   : > { %p1749_p7 = por %p1748_p5, %p1747_p4 }
  0x43   : > { %p1750_p9 = pnand %p1749_p7, %p1743_p10 }
  0x45   : > { %1753 = shalt.err (!%p1750_p9)
}
  0x46   : > { %s1754_s0 = scalar_lea.vmem %s2056_s29, 1024  ;;  %s1876_s14 = smov [#allocation5]  }
  0x47   : > { %p1755_p11 = scmp.ne.s32.totalorder %s2056_s29, %s1754_s0  ;;  %s1759_s12 = sshll.u32 %s1876_s14, 4  ;;  %s1760_s12 = int_to_ptr.vmem [resolvable:$false] %s1759_s12 }
  0x48   : > { %s1761_s13 = scalar_lea.vmem %s1760_s12, 2048  ;;  %p1762_p6 = scmp.lt.s32.totalorder %s2056_s29, %s1760_s12 }
  0x49   : > { %p1757_p3 = pnand %p1755_p11, %p1711_p1  ;;  %p1763_p0 = scmp.lt.s32.totalorder %s1761_s13, %s1754_s0 }
  0x4b   : > { %p1758_p8 = pneg %p1757_p3  ;;  %p1764_p2 = por %p1763_p0, %p1762_p6 }
  0x4d   : > { %p1765_p4 = pnand %p1764_p2, %p1758_p8 }
  0x4f   : > { %1768 = shalt.err (!%p1765_p4)
}
  0x50   : > { %s2435_s26 = smov 128   ;;  %329 = sbr.rel (%p2043_p12) target bundleno = 1601 (0x641), region = 48 }
  0x51   : > { %1639 = dma.hbm_to_vmem [thread:$0]  (!%p2004_p13), %s2052_s21, 1024, %s2056_s29, %s298_s24, %s2435_s26, %s2435_s26, %s1875_s15  }
  0x52   : > { %s2090_s22 = sand.u32 (!%p2043_p12), 1, %s1863_s28   ;;  %p2436_p6 = scmp.ne.s32.totalorder (!%p2043_p12), %s2427_s16, 0 }
  0x53   : > { %s1496_s25 = sshll.u32 (!%p2043_p12), %s2090_s22, 6  ;;  %s332_s23 = scalar_lea.sflag (!%p2043_p12), [#allocation3], %s2090_s22 }
  0x54   : > { %s2094_s10 = scalar_lea.vmem (!%p2043_p12), [#allocation2], %s1496_s25 }
  0x57   : > { %1842 = dma.done.wait (%p2436_p6), %s332_s23, 1024  }
  0x58   : > { %1844 = vsyncadd (%p2436_p6), %s332_s23, 4294966272  ;;  %s341_s29 = scalar_lea.sflag [#allocation6], %s2090_s22  ;;  %s2101_s19 = scalar_lea.vmem [#allocation5], %s1496_s25 }
  0x59   : > { %1846 = dma.done.wait (%p2436_p6), %s341_s29, 1024  }
  0x5a   : > { %1848 = vsyncadd (%p2436_p6), %s341_s29, 4294966272  ;;  %v1877_v0 = vmov 0   ;;  %v414_v1 = vld [vmem:[%s2411_s3 + $0x10] sm:$0xff]  ;;  %v412_v2 = vld [vmem:[%s2411_s3] sm:$0xff]  ;;  %s1500_s24 = sshll.u32 %s1951_s9, 2  ;;  %vm507_vm0 = vcmask 261120  }
  0x5b   : > { %1690 = vset.pattern.permute.xlu1 %v1877_v0  ;;  %1689 = vset.pattern.permute.xlu0 %v1877_v0  ;;  %v415_v3 = vld [vmem:[%s2411_s3 + $0x18] sm:$0xff]  ;;  %v413_v4 = vld [vmem:[%s2411_s3 + $0x8] sm:$0xff]  ;;  %v496_v5 = vld [vmem:[%s2412_s4] sm:$0xff]  ;;  %p394_p13 = scmp.lt.s32.totalorder %s1500_s24, 7  ;;  %vm743_vm1 = vcmask 130112   ;;  %vm772_vm2 = vcmask 1041409  }
  0x5c   : > { %480 = vperm.xlu1 %1690, %v414_v1   ;;  %462 = vperm.xlu0 %1689, %v412_v2   ;;  %v497_v6 = vld [vmem:[%s2412_s4 + $0x8] sm:$0xff]  ;;  %v498_v8 = vld [vmem:[%s2412_s4 + $0x10] sm:$0xff]  ;;  %v499_v9 = vld [vmem:[%s2412_s4 + $0x18] sm:$0xff]  ;;  %vm774_vm3 = vcmask 1042434   ;;  %vm776_vm4 = vcmask 1043459   ;;  %vm779_vm5 = vcmask 125952  }
  0x5d   : > { %v1605_v7 = vpack.c.bf16 %v497_v6, %v496_v5  ;;  %v1609_v10 = vpack.c.bf16 %v499_v9, %v498_v8  ;;  %s2446_s24 = smov (!%p394_p13, %s1500_s24), 7  ;;  %v400_v12 = vld [vmem:[%s2101_s19] sm:$0xff]  ;;  %v402_v13 = vld [vmem:[%s2101_s19 + $0x10] sm:$0xff]  ;;  %v401_v16 = vld [vmem:[%s2101_s19 + $0x8] sm:$0xff]  ;;  %vm1879_vm6 = vmmov 0   ;;  %s1498_s14 = sshll.u32 %s2090_s22, 2 }
  0x5e   : > { %s396_s16 = scalar_lea.vmem %s2410_s2, %s2446_s24  ;;  %v403_v18 = vld [vmem:[%s2101_s19 + $0x18] sm:$0xff]  ;;  %v404_v19 = vld [vmem:[%s2101_s19 + $0x20] sm:$0xff]  ;;  %v405_v28 = vld [vmem:[%s2101_s19 + $0x28] sm:$0xff]  ;;  %vm1005_vm7 = vcmask 122880   ;;  %vm1018_vm8 = vcmask 130048   ;;  %s1313_s25 = scalar_lea.sflag [#allocation4], %s2090_s22 }
  0x5f   : > { %1606 = vmatprep.subr.bf16.mxu0 %v1605_v7  ;;  %v1501_v11 = vld [vmem:[%s396_s16] ss:$0 sm:$0xff]  ;;  %v1502_v14 = vld [vmem:[%s396_s16 + $0x1] ss:$0 sm:$0xff]  ;;  %v1503_v20 = vld [vmem:[%s396_s16 + $0x2] ss:$0 sm:$0xff] }
  0x60   : > { %485 = vperm.xlu1 %1690, %v415_v3   ;;  %467 = vperm.xlu0 %1689, %v413_v4   ;;  %v444_v15 = vadd.f32 %v1501_v11, %v400_v12  ;;  %v446_v17 = vadd.f32 %v1502_v14, %v402_v13  ;;  %v445_v21 = vadd.f32 %v1501_v11, %v401_v16  ;;  %v406_v29 = vld [vmem:[%s2101_s19 + $0x30] sm:$0xff]  ;;  %v1504_v30 = vld [vmem:[%s396_s16 + $0x3] ss:$0 sm:$0xff]  ;;  %v407_v40 = vld [vmem:[%s2101_s19 + $0x38] sm:$0xff]  ;;  %s2282_s16 = scalar_lea.vmem [#allocation7], %s1498_s14  ;;  %s1531_s19 = sshll.u32 %s1951_s9, 6 }
  0x61   : > { %1608 = vmatpush3.bf16.msra.mxu0 %v1605_v7  ;;  %v447_v23 = vadd.f32 %v1502_v14, %v403_v18  ;;  %v448_v26 = vadd.f32 %v1503_v20, %v404_v19  ;;  %v449_v33 = vadd.f32 %v1503_v20, %v405_v28  ;;  %v450_v36 = vadd.f32 %v1504_v30, %v406_v29  ;;  %v1505_v59 = vld [vmem:[%s2413_s5] ss:$0 sm:$0xff]  ;;  %s2323_s26 = scalar_lea.hbm %s2415_s7, %s1531_s19  ;;  %p2437_p12 = scmp.ne.s32.totalorder %s2428_s17, 0 }
  0x62   : > { %1610 = vmatprep.subr.bf16.mxu0 %v1609_v10  ;;  %v452_v22 = vmax.f32 %v444_v15, 0.0  ;;  %v454_v27 = vmax.f32 %v446_v17, 0.0  ;;  %v453_v31 = vmax.f32 %v445_v21, 0.0  ;;  %v451_v43 = vadd.f32 %v1504_v30, %v407_v40  ;;  %v1514_v0 = vld [vmem:[%s2414_s6] ss:$0 sm:$0xff]  ;;  %s1881_s29 = smov [#allocation7]  }
  0x63   : > { %v455_v34 = vmax.f32 %v447_v23, 0.0  ;;  %v456_v37 = vmax.f32 %v448_v26, 0.0  ;;  %v457_v44 = vmax.f32 %v449_v33, 0.0  ;;  %v458_v47 = vmax.f32 %v450_v36, 0.0  ;;  %s1773_s15 = sshll.u32 %s1881_s29, 4  ;;  %s1774_s15 = int_to_ptr.vmem [resolvable:$false] %s1773_s15 }
  0x64   : > { %v459_v50 = vmax.f32 %v451_v43, 0.0  ;;  %s1775_s20 = scalar_lea.vmem %s1774_s15, 128 }
  0x65   : > { %1612 = vmatpush3.bf16.msra.mxu0 %v1609_v10 }
  0xdb   : > { %v481_v24 = vpop.permute.xlu1 %480  ;;  %v463_v25 = vpop.permute.xlu0 %462 }
  0xdc   : > { %v470_v32 = vmul.f32 %v463_v25, %v452_v22  ;;  %v472_v38 = vmul.f32 %v463_v25, %v454_v27  ;;  %v474_v48 = vmul.f32 %v463_v25, %v456_v37  ;;  %v476_v53 = vmul.f32 %v463_v25, %v458_v47  ;;  %v417_v37 = vld [vmem:[%s2411_s3 + $0x28] sm:$0xff] }
  0xde   : > { %v488_v35 = vadd.f32 %v481_v24, %v470_v32  ;;  %v490_v49 = vadd.f32 %v481_v24, %v472_v38  ;;  %v492_v54 = vadd.f32 %v481_v24, %v474_v48  ;;  %v494_v57 = vadd.f32 %v481_v24, %v476_v53  ;;  %v416_v38 = vld [vmem:[%s2411_s3 + $0x20] sm:$0xff] }
  0xdf   : > { %v468_v39 = vpop.permute.xlu0 %467  ;;  %v486_v42 = vpop.permute.xlu1 %485 }
  0xe0   : > { %v471_v41 = vmul.f32 %v468_v39, %v453_v31  ;;  %1565 = vmatprep.mubr.msk.f32.mxu0 %vm507_vm0, %v488_v35  ;;  %v473_v45 = vmul.f32 %v468_v39, %v455_v34  ;;  %v475_v51 = vmul.f32 %v468_v39, %v457_v44  ;;  %v477_v55 = vmul.f32 %v468_v39, %v459_v50  ;;  %v419_v39 = vld [vmem:[%s2411_s3 + $0x38] sm:$0xff] }
  0xe2   : > { %v489_v46 = vadd.f32 %v486_v42, %v471_v41  ;;  %v491_v52 = vadd.f32 %v486_v42, %v473_v45  ;;  %v493_v56 = vadd.f32 %v486_v42, %v475_v51  ;;  %v495_v58 = vadd.f32 %v486_v42, %v477_v55  ;;  %v418_v42 = vld [vmem:[%s2411_s3 + $0x30] sm:$0xff] }
  0xe4   : > { %1566 = vmatmul.mubr.msk.f32.vlgmr.msra.gmra.mrb[0].mxu0 %vm507_vm0, %v489_v46 }
  0xe5   : > { %1568 = vmatprep.mubr.msk.f32.mxu0 %vm507_vm0, %v490_v49 }
  0xe8   : > { %1569 = vmatmul.mubr.msk.f32.gmra.mrb[2].mxu0 %vm507_vm0, %v491_v52 }
  0xe9   : > { %1571 = vmatprep.mubr.msk.f32.mxu0 %vm507_vm0, %v492_v54 }
  0xec   : > { %1572 = vmatmul.mubr.msk.f32.gmra.mrb[4].mxu0 %vm507_vm0, %v493_v56 }
  0xed   : > { %1574 = vmatprep.mubr.msk.f32.mxu0 %vm507_vm0, %v494_v57 }
  0xf0   : > { %1575 = vmatmul.mubr.msk.f32.gmra.mrb[6].mxu0 %vm507_vm0, %v495_v58 }
 0x1b7   : > { %v1567_v60 = vpop.f32.mrb[0].mxu0 }
 0x1b8   : > { %v604_v61 = vadd.f32 %v1567_v60, %v1505_v59  ;;  %v598_v62 = vpop.f32.mrb[1].mxu0 }
 0x1b9   : > { %v599_v63 = vadd.f32 %v1505_v59, %v598_v62 }
 0x1ba   : > { %v638_v1 = vmax.f32 %v604_v61, 0.0 }
 0x1bb   : > { %v637_v2 = vmax.f32 %v599_v63, 0.0  ;;  %v1570_v3 = vpop.f32.mrb[2].mxu0 }
 0x1bc   : > { %v614_v4 = vadd.f32 %v1570_v3, %v1505_v59  ;;  %v608_v5 = vpop.f32.mrb[3].mxu0  ;;  %v653_v6 = vmul.f32 %v1514_v0, %v638_v1  ;;  %v732_v1 = vlaneseq }
 0x1bd   : > { %v609_v7 = vadd.f32 %v1505_v59, %v608_v5  ;;  %v652_v8 = vmul.f32 %v1514_v0, %v637_v2 }
 0x1be   : > { %v640_v9 = vmax.f32 %v614_v4, 0.0  ;;  %v663_v10 = vsel %vm507_vm0, %v653_v6, 0.0  ;;  %v733_v3 = vand.u32 127, %v732_v1  ;;  %v2201_v6 = vshrl.u32 %v732_v1, 7 }
 0x1bf   : > { %v639_v11 = vmax.f32 %v609_v7, 0.0  ;;  %664 = vadd.xlane.f32.xlu1 %v663_v10  ;;  %v1573_v12 = vpop.f32.mrb[4].mxu0  ;;  %v660_v13 = vsel %vm507_vm0, %v652_v8, 0.0 }
 0x1c0   : > { %v624_v14 = vadd.f32 %v1573_v12, %v1505_v59  ;;  %v618_v15 = vpop.f32.mrb[5].mxu0  ;;  %661 = vadd.xlane.f32.xlu0 %v660_v13  ;;  %v655_v16 = vmul.f32 %v1514_v0, %v640_v9  ;;  %v738_v7 = vadd.s32 4294967288, %v733_v3 }
 0x1c1   : > { %v619_v17 = vadd.f32 %v1505_v59, %v618_v15  ;;  %v654_v19 = vmul.f32 %v1514_v0, %v639_v11  ;;  %v2207_v11 = vsub.s32 %v733_v3, %v2201_v6 }
 0x1c2   : > { %v669_v18 = vsel %vm507_vm0, %v655_v16, 0.0  ;;  %v642_v20 = vmax.f32 %v624_v14, 0.0  ;;  %v2204_v10 = vsub.s32 %v738_v7, %v2201_v6 }
 0x1c3   : > { %v641_v21 = vmax.f32 %v619_v17, 0.0  ;;  %v1576_v22 = vpop.f32.mrb[6].mxu0  ;;  %v666_v27 = vsel %vm507_vm0, %v654_v19, 0.0 }
 0x1c4   : > { %v634_v23 = vadd.f32 %v1576_v22, %v1505_v59  ;;  %v628_v24 = vpop.f32.mrb[7].mxu0  ;;  %670 = vadd.xlane.f32.xlu0 %v669_v18  ;;  %v657_v31 = vmul.f32 %v1514_v0, %v642_v20 }
 0x1c5   : > { %v629_v25 = vadd.f32 %v1505_v59, %v628_v24  ;;  %v656_v26 = vmul.f32 %v1514_v0, %v641_v21 }
 0x1c6   : > { %v644_v28 = vmax.f32 %v634_v23, 0.0  ;;  %v675_v34 = vsel %vm507_vm0, %v657_v31, 0.0  ;;  %v786_v31 = vsub.s32 0, %v2201_v6 }
 0x1c7   : > { %v643_v29 = vmax.f32 %v629_v25, 0.0  ;;  %v672_v30 = vsel %vm507_vm0, %v656_v26, 0.0 }
 0x1c8   : > { %673 = vadd.xlane.f32.xlu1 %v672_v30  ;;  %667 = vadd.xlane.f32.xlu0 %v666_v27  ;;  %v659_v35 = vmul.f32 %v1514_v0, %v644_v28 }
 0x1c9   : > { %v658_v32 = vmul.f32 %v1514_v0, %v643_v29 }
 0x1ca   : > { %v681_v36 = vsel %vm507_vm0, %v659_v35, 0.0 }
 0x1cb   : > { %v678_v33 = vsel %vm507_vm0, %v658_v32, 0.0  ;;  %v790_v32 = vsub.s32 1, %v2201_v6 }
 0x1cc   : > { %679 = vadd.xlane.f32.xlu1 %v678_v33  ;;  %676 = vadd.xlane.f32.xlu0 %v675_v34 }
 0x1d0   : > { %682 = vadd.xlane.f32.xlu0 %v681_v36 }
 0x24c   : > { %v665_v40 = vpop.xlane.xlu1 %664 }
 0x24d   : > { %v685_v41 = vmul.f32 %v665_v40, %v417_v37  ;;  %v662_v43 = vpop.xlane.xlu0 %661 }
 0x24e   : > { %v684_v44 = vmul.f32 %v662_v43, %v416_v38 }
 0x24f   : > { %v2177_v45 = vadd.f32 %v685_v41, %v419_v39 }
 0x250   : > { %v2179_v46 = vadd.f32 %v684_v44, %v418_v42 }
 0x251   : > { %712 = vperm.xlu0 %1689, %v2177_v45   ;;  %v671_v47 = vpop.xlane.xlu0 %670 }
 0x252   : > { %v687_v48 = vmul.f32 %v671_v47, %v417_v37  ;;  %709 = vperm.xlu1 %1690, %v2179_v46   ;;  %v798_v47 = vsub.s32 3, %v2201_v6 }
 0x254   : > { %v2183_v49 = vadd.f32 %v687_v48, %v419_v39 }
 0x255   : > { %v674_v50 = vpop.xlane.xlu1 %673  ;;  %v668_v51 = vpop.xlane.xlu0 %667 }
 0x256   : > { %v688_v52 = vmul.f32 %v674_v50, %v416_v38  ;;  %v686_v53 = vmul.f32 %v668_v51, %v416_v38  ;;  %718 = vperm.xlu1 %1690, %v2183_v49  }
 0x258   : > { %v2186_v54 = vadd.f32 %v688_v52, %v418_v42  ;;  %v2188_v55 = vadd.f32 %v686_v53, %v418_v42 }
 0x259   : > { %v680_v56 = vpop.xlane.xlu1 %679  ;;  %v677_v57 = vpop.xlane.xlu0 %676 }
 0x25a   : > { %v690_v58 = vmul.f32 %v680_v56, %v416_v38  ;;  %v689_v59 = vmul.f32 %v677_v57, %v417_v37  ;;  %721 = vperm.xlu0 %1689, %v2186_v54   ;;  %715 = vperm.xlu1 %1690, %v2188_v55  }
 0x25c   : > { %v2192_v60 = vadd.f32 %v690_v58, %v418_v42  ;;  %v2194_v61 = vadd.f32 %v689_v59, %v419_v39 }
 0x25d   : > { %v683_v62 = vpop.xlane.xlu0 %682 }
 0x25e   : > { %v691_v63 = vmul.f32 %v683_v62, %v417_v37  ;;  %727 = vperm.xlu0 %1689, %v2192_v60   ;;  %724 = vperm.xlu1 %1690, %v2194_v61  }
 0x260   : > { %v2198_v0 = vadd.f32 %v691_v63, %v419_v39  ;;  %v794_v39 = vsub.s32 2, %v2201_v6 }
 0x262   : > { %730 = vperm.xlu1 %1690, %v2198_v0  }
 0x2d0   : > { %v713_v4 = vpop.permute.xlu0 %712 }
 0x2d1   : > { %v710_v2 = vpop.permute.xlu1 %709  ;;  %v742_v14 = vrot.slane %v713_v4, %v2204_v10 }
 0x2d2   : > { %v737_v15 = vrot.slane %v710_v2, %v2207_v11 }
 0x2d4   : > { %v744_v23 = vsel %vm743_vm1, %v742_v14, %v737_v15 }
 0x2d5   : > { %v719_v5 = vpop.permute.xlu1 %718 }
 0x2d6   : > { %v752_v16 = vrot.slane %v719_v5, %v2204_v10 }
 0x2d9   : > { %v716_v8 = vpop.permute.xlu1 %715  ;;  %v722_v9 = vpop.permute.xlu0 %721 }
 0x2da   : > { %v748_v12 = vrot.slane %v716_v8, %v2207_v11  ;;  %v757_v18 = vrot.slane %v722_v9, %v2207_v11 }
 0x2dc   : > { %v753_v20 = vsel %vm743_vm1, %v752_v16, %v748_v12 }
 0x2dd   : > { %v725_v13 = vpop.permute.xlu1 %724  ;;  %v728_v19 = vpop.permute.xlu0 %727  ;;  %v773_v26 = vsel %vm772_vm2, %v753_v20, %v744_v23 }
 0x2de   : > { %v761_v17 = vrot.slane %v725_v13, %v2204_v10  ;;  %v766_v24 = vrot.slane %v728_v19, %v2207_v11 }
 0x2e0   : > { %v762_v21 = vsel %vm743_vm1, %v761_v17, %v757_v18 }
 0x2e1   : > { %v731_v22 = vpop.permute.xlu1 %730  ;;  %v775_v28 = vsel %vm774_vm3, %v762_v21, %v773_v26 }
 0x2e2   : > { %v770_v25 = vrot.slane %v731_v22, %v2204_v10 }
 0x2e4   : > { %v771_v27 = vsel %vm743_vm1, %v770_v25, %v766_v24 }
 0x2e5   : > { %v777_v29 = vsel %vm776_vm4, %v771_v27, %v775_v28  ;;  %v1878_v27 = vmov 0.0|0.0  }
 0x2e6   : > { %v780_v30 = vsel %vm779_vm5, %v777_v29, -inf  ;;  %1613 = vmatprep.subr.bf16.mxu1 %v1878_v27 }
 0x2e7   : > { %781 = vmax.xlane.f32.xlu0 %v780_v30 }
 0x374   : > { %v782_v33 = vpop.xlane.xlu0 %781 }
 0x375   : > { %v787_v34 = vrot.slane %v782_v33, %v786_v31  ;;  %v791_v35 = vrot.slane %v782_v33, %v790_v32  ;;  %v795_v42 = vrot.slane %v782_v33, %v794_v39  ;;  %v799_v50 = vrot.slane %v782_v33, %v798_v47 }
 0x377   : > { %v804_v36 = vsub.f32 %v2179_v46, %v787_v34  ;;  %v805_v37 = vsub.f32 %v2177_v45, %v787_v34  ;;  %v806_v40 = vsub.f32 %v2188_v55, %v791_v35  ;;  %v807_v43 = vsub.f32 %v2183_v49, %v791_v35 }
 0x378   : > { %v808_v46 = vsub.f32 %v2186_v54, %v795_v42  ;;  %v809_v51 = vsub.f32 %v2194_v61, %v795_v42  ;;  %v810_v49 = vsub.f32 %v2192_v60, %v799_v50  ;;  %v811_v54 = vsub.f32 %v2198_v0, %v799_v50  ;;  %v1013_v50 = vld [vmem:[%s2094_s10 + $0x18] sm:$0xff] }
 0x379   : > { %v812_v38 = vmul.f32 1.442695, %v804_v36  ;;  %v814_v41 = vmul.f32 1.442695, %v805_v37  ;;  %v816_v44 = vmul.f32 1.442695, %v806_v40 }
 0x37a   : > { %v818_v45 = vmul.f32 1.442695, %v807_v43  ;;  %v820_v52 = vmul.f32 1.442695, %v808_v46  ;;  %v822_v55 = vmul.f32 1.442695, %v809_v51 }
 0x37b   : > { %1691 = vpow2.f32 %v812_v38  ;;  %v824_v57 = vmul.f32 1.442695, %v810_v49  ;;  %v826_v59 = vmul.f32 1.442695, %v811_v54  ;;  %v1010_v36 = vld [vmem:[%s2094_s10] sm:$0xff]  ;;  %v1011_v37 = vld [vmem:[%s2094_s10 + $0x8] sm:$0xff] }
 0x37c   : > { %1693 = vpow2.f32 %v814_v41  ;;  %v1614_v38 = vpack.c.bf16 %v1011_v37, %v1010_v36  ;;  %v1880_v40 = vmov 0.0  }
 0x37d   : > { %1695 = vpow2.f32 %v816_v44  ;;  %1581 = vmatprep.mubr.msk.f32.mxu1 %vm1879_vm6, %v1880_v40 }
 0x37e   : > { %1697 = vpow2.f32 %v818_v45  ;;  %1615 = vmatpush3.bf16.msra.mxu1 %v1614_v38 }
 0x37f   : > { %1699 = vpow2.f32 %v820_v52  ;;  %1616 = vmatprep.subr.bf16.mxu1 %v1878_v27 }
 0x380   : > { %1701 = vpow2.f32 %v822_v55  ;;  %v1014_v55 = vld [vmem:[%s2094_s10 + $0x20] sm:$0xff] }
 0x381   : > { %1703 = vpow2.f32 %v824_v57 }
 0x382   : > { %1705 = vpow2.f32 %v826_v59 }
 0x385   : > { %v1692_v48 = vpop.eup %1691 }
 0x386   : > { %837 = vperm.xlu1 %1690, %v1692_v48   ;;  %v1694_v53 = vpop.eup %1693 }
 0x387   : > { %v1696_v56 = vpop.eup %1695 }
 0x388   : > { %v1698_v58 = vpop.eup %1697 }
 0x389   : > { %v1700_v62 = vpop.eup %1699 }
 0x38a   : > { %840 = vperm.xlu1 %1690, %v1694_v53   ;;  %v1702_v61 = vpop.eup %1701 }
 0x38b   : > { %v1704_v63 = vpop.eup %1703 }
 0x38c   : > { %v1706_v60 = vpop.eup %1705 }
 0x38e   : > { %843 = vperm.xlu1 %1690, %v1696_v56  }
 0x392   : > { %846 = vperm.xlu1 %1690, %v1698_v58  }
 0x396   : > { %849 = vperm.xlu1 %1690, %v1700_v62  }
 0x39a   : > { %852 = vperm.xlu1 %1690, %v1702_v61  }
 0x39e   : > { %855 = vperm.xlu1 %1690, %v1704_v63  }
 0x3a2   : > { %858 = vperm.xlu1 %1690, %v1706_v60  }
 0x405   : > { %v838_v1 = vpop.permute.xlu1 %837 }
 0x406   : > { %v863_v15 = vrot.slane %v838_v1, %v2207_v11 }
 0x409   : > { %v841_v2 = vpop.permute.xlu1 %840 }
 0x40a   : > { %v867_v12 = vrot.slane %v841_v2, %v2204_v10 }
 0x40c   : > { %v868_v19 = vsel %vm743_vm1, %v867_v12, %v863_v15 }
 0x40d   : > { %v844_v3 = vpop.permute.xlu1 %843 }
 0x40e   : > { %v872_v13 = vrot.slane %v844_v3, %v2207_v11 }
 0x411   : > { %v847_v4 = vpop.permute.xlu1 %846 }
 0x412   : > { %v876_v7 = vrot.slane %v847_v4, %v2204_v10 }
 0x414   : > { %v877_v16 = vsel %vm743_vm1, %v876_v7, %v872_v13 }
 0x415   : > { %v850_v0 = vpop.permute.xlu1 %849  ;;  %v896_v22 = vsel %vm772_vm2, %v877_v16, %v868_v19 }
 0x416   : > { %v881_v14 = vrot.slane %v850_v0, %v2207_v11 }
 0x419   : > { %v853_v5 = vpop.permute.xlu1 %852 }
 0x41a   : > { %v885_v8 = vrot.slane %v853_v5, %v2204_v10 }
 0x41c   : > { %v886_v17 = vsel %vm743_vm1, %v885_v8, %v881_v14 }
 0x41d   : > { %v856_v9 = vpop.permute.xlu1 %855  ;;  %v897_v24 = vsel %vm774_vm3, %v886_v17, %v896_v22 }
 0x41e   : > { %v890_v20 = vrot.slane %v856_v9, %v2207_v11 }
 0x421   : > { %v859_v18 = vpop.permute.xlu1 %858 }
 0x422   : > { %v894_v21 = vrot.slane %v859_v18, %v2204_v10 }
 0x424   : > { %v895_v23 = vsel %vm743_vm1, %v894_v21, %v890_v20 }
 0x425   : > { %v898_v25 = vsel %vm776_vm4, %v895_v23, %v897_v24 }
 0x426   : > { %v900_v26 = vsel %vm779_vm5, %v898_v25, 0.0 }
 0x427   : > { %901 = vadd.xlane.f32.xlu0 %v900_v26 }
 0x4b4   : > { %v902_v28 = vpop.xlane.xlu0 %901 }
 0x4b5   : > { %1707 = vrcp.f32 %v902_v28 }
 0x4bf   : > { %v1708_v29 = vpop.eup %1707 }
 0x4c0   : > { %v908_v30 = vrot.slane %v1708_v29, %v786_v31  ;;  %v912_v35 = vrot.slane %v1708_v29, %v790_v32  ;;  %v916_v32 = vrot.slane %v1708_v29, %v794_v39  ;;  %v920_v44 = vrot.slane %v1708_v29, %v798_v47 }
 0x4c2   : > { %v926_v33 = vmul.f32 %v1694_v53, %v908_v30  ;;  %v925_v34 = vmul.f32 %v1692_v48, %v908_v30  ;;  %v927_v41 = vmul.f32 %v1696_v56, %v912_v35  ;;  %v928_v31 = vmul.f32 %v1698_v58, %v912_v35  ;;  %v1012_v48 = vld [vmem:[%s2094_s10 + $0x10] sm:$0xff]  ;;  %v1015_v56 = vld [vmem:[%s2094_s10 + $0x28] sm:$0xff] }
 0x4c3   : > { %v929_v42 = vmul.f32 %v1700_v62, %v916_v32  ;;  %v930_v43 = vmul.f32 %v1702_v61, %v916_v32  ;;  %v931_v46 = vmul.f32 %v1704_v63, %v920_v44  ;;  %v932_v45 = vmul.f32 %v1706_v60, %v920_v44  ;;  %v1016_v63 = vld [vmem:[%s2094_s10 + $0x30] sm:$0xff]  ;;  %v1017_v60 = vld [vmem:[%s2094_s10 + $0x38] sm:$0xff]  ;;  %s1331_s10 = sshll.u32 %s2282_s16, 4  ;;  %s2315_s10 = int_to_ptr.vmem [resolvable:$true] %s1331_s10 }
 0x4c4   : > { %945 = vperm.xlu0 %1689, %v926_v33   ;;  %942 = vperm.xlu1 %1690, %v925_v34   ;;  %v1617_v6 = vpack.c.bf16 %v1013_v50, %v1012_v48  ;;  %v1620_v59 = vpack.c.bf16 %v1015_v56, %v1014_v55  ;;  %v1623_v4 = vpack.c.bf16 %v1017_v60, %v1016_v63  ;;  %s1769_s23 = scalar_lea.vmem %s2315_s10, 64  ;;  %p1776_p7 = scmp.lt.s32.totalorder %s2315_s10, %s1774_s15 }
 0x4c5   : > { %p1770_p1 = scmp.ne.s32.totalorder %s2315_s10, %s1769_s23  ;;  %p1777_p9 = scmp.lt.s32.totalorder %s1775_s20, %s1769_s23 }
 0x4c7   : > { %p1771_p10 = pnand %p1770_p1, %p2437_p12  ;;  %p1778_p11 = por %p1777_p9, %p1776_p7 }
 0x4c8   : > { %948 = vperm.xlu1 %1690, %v927_v41  }
 0x4c9   : > { %p1772_p5 = pneg %p1771_p10 }
 0x4cb   : > { %p1779_p3 = pnand %p1778_p11, %p1772_p5 }
 0x4cc   : > { %951 = vperm.xlu1 %1690, %v928_v31  }
 0x4d0   : > { %954 = vperm.xlu1 %1690, %v929_v42  }
 0x4d4   : > { %957 = vperm.xlu1 %1690, %v930_v43  }
 0x4d8   : > { %960 = vperm.xlu1 %1690, %v931_v46  }
 0x4dc   : > { %963 = vperm.xlu1 %1690, %v932_v45  }
 0x543   : > { %v946_v51 = vpop.permute.xlu0 %945  ;;  %v943_v39 = vpop.permute.xlu1 %942 }
 0x544   : > { %v972_v52 = vrot.slane %v946_v51, %v2204_v10  ;;  %v968_v53 = vrot.slane %v943_v39, %v2207_v11 }
 0x546   : > { %v973_v47 = vsel %vm743_vm1, %v972_v52, %v968_v53 }
 0x547   : > { %1006 = vst.msk [vmem:[%s2282_s16] sm:$0x1] %vm1005_vm7, %v973_v47  ;;  %1582 = vmatmul.mubr.msk.f32.vlgmr.msra.gmra.mrb[0].mxu1 %vm1018_vm8, %v973_v47  ;;  %v949_v49 = vpop.permute.xlu1 %948 }
 0x548   : > { %1618 = vmatpush3.bf16.msra.mxu1 %v1617_v6  ;;  %1588 = vmatprep.mubr.msk.f32.mxu1 %vm1879_vm6, %v1880_v40  ;;  %v977_v57 = vrot.slane %v949_v49, %v2207_v11 }
 0x549   : > { %1619 = vmatprep.subr.bf16.mxu1 %v1878_v27 }
 0x54b   : > { %v952_v54 = vpop.permute.xlu1 %951 }
 0x54c   : > { %v981_v58 = vrot.slane %v952_v54, %v2204_v10 }
 0x54e   : > { %v982_v62 = vsel %vm743_vm1, %v981_v58, %v977_v57 }
 0x54f   : > { %1007 = vst.msk [vmem:[%s2282_s16 + $0x1] sm:$0x1] %vm1005_vm7, %v982_v62  ;;  %1589 = vmatmul.mubr.msk.f32.vlgmr.msra.gmra.mrb[2].mxu1 %vm1018_vm8, %v982_v62  ;;  %v955_v61 = vpop.permute.xlu1 %954 }
 0x550   : > { %1621 = vmatpush3.bf16.msra.mxu1 %v1620_v59  ;;  %1595 = vmatprep.mubr.msk.f32.mxu1 %vm1879_vm6, %v1880_v40  ;;  %v986_v2 = vrot.slane %v955_v61, %v2207_v11 }
 0x551   : > { %1622 = vmatprep.subr.bf16.mxu1 %v1878_v27 }
 0x553   : > { %v958_v1 = vpop.permute.xlu1 %957 }
 0x554   : > { %v990_v3 = vrot.slane %v958_v1, %v2204_v10 }
 0x556   : > { %v991_v0 = vsel %vm743_vm1, %v990_v3, %v986_v2 }
 0x557   : > { %1008 = vst.msk [vmem:[%s2282_s16 + $0x2] sm:$0x1] %vm1005_vm7, %v991_v0  ;;  %1596 = vmatmul.mubr.msk.f32.vlgmr.msra.gmra.mrb[4].mxu1 %vm1018_vm8, %v991_v0  ;;  %v961_v5 = vpop.permute.xlu1 %960 }
 0x558   : > { %1624 = vmatpush3.bf16.msra.mxu1 %v1623_v4  ;;  %1602 = vmatprep.mubr.msk.f32.mxu1 %vm1879_vm6, %v1880_v40  ;;  %v995_v8 = vrot.slane %v961_v5, %v2207_v11 }
 0x55b   : > { %v964_v7 = vpop.permute.xlu1 %963 }
 0x55c   : > { %v999_v9 = vrot.slane %v964_v7, %v2204_v10 }
 0x55e   : > { %v1000_v12 = vsel %vm743_vm1, %v999_v9, %v995_v8 }
 0x55f   : > { %1009 = vst.msk [vmem:[%s2282_s16 + $0x3] sm:$0x1] %vm1005_vm7, %v1000_v12  ;;  %1603 = vmatmul.mubr.msk.f32.vlgmr.msra.gmra.mrb[6].mxu1 %vm1018_vm8, %v1000_v12 }
 0x560   : > { %1782 = shalt.err (!%p1779_p3)
}
 0x561   : > { %s1783_s21 = scalar_lea.hbm %s2323_s26, 64  ;;  %s1787_s16 = scalar_lea.hbm %s2415_s7, 128 }
 0x562   : > { %p1784_p8 = scmp.ne.s32.totalorder %s2323_s26, %s1783_s21  ;;  %p1788_p4 = scmp.lt.u32.totalorder %s2323_s26, %s2415_s7 }
 0x563   : > { %p1789_p6 = scmp.lt.u32.totalorder %s1787_s16, %s1783_s21  ;;  %p1791_p1 = scmp.lt.u32.totalorder %s1783_s21, %s2323_s26 }
 0x564   : > { %p1785_p0 = pnand %p1784_p8, %p2437_p12 }
 0x565   : > { %p1790_p13 = por %p1789_p6, %p1788_p4 }
 0x566   : > { %p1786_p2 = pneg %p1785_p0 }
 0x567   : > { %p1792_p10 = por %p1791_p1, %p1790_p13 }
 0x569   : > { %p1793_p5 = pnand %p1792_p10, %p1786_p2 }
 0x56b   : > { %1796 = shalt.err (!%p1793_p5)
}
 0x56c   : > { %s1882_s23 = smov 16   ;;  %s1883_s29 = smov 1   ;;  %vm1307_vm9 = vcmask 516096  }
 0x56d   : > { %1629 = dma.vmem_to_hbm [thread:$0]  (%p2437_p12), %s2315_s10, 64, %s2323_s26, %s1313_s25, %s1882_s23, %s1882_s23, %s1883_s29  }
 0x56e   : > { %s390_s15 = scalar_lea.vmem [#allocation8], %s1498_s14  ;;  %s2361_s14 = scalar_lea.hbm %s2416_s8, %s1531_s19 }
 0x56f   : > { %s1347_s20 = sshll.u32 %s390_s15, 4  ;;  %s1318_s26 = scalar_lea.sflag [#allocation9], %s2090_s22  ;;  %s2354_s20 = int_to_ptr.vmem [resolvable:$true] %s1347_s20 }
 0x570   : > { %s1797_s25 = scalar_lea.vmem %s2354_s20, 64  ;;  %s1884_s24 = smov [#allocation8]  }
 0x571   : > { %p1798_p7 = scmp.ne.s32.totalorder %s2354_s20, %s1797_s25  ;;  %s1801_s0 = sshll.u32 %s1884_s24, 4  ;;  %s1802_s0 = int_to_ptr.vmem [resolvable:$false] %s1801_s0 }
 0x572   : > { %s1803_s9 = scalar_lea.vmem %s1802_s0, 128  ;;  %p1804_p3 = scmp.lt.s32.totalorder %s2354_s20, %s1802_s0 }
 0x573   : > { %p1799_p9 = pnand %p1798_p7, %p2437_p12  ;;  %p1805_p8 = scmp.lt.s32.totalorder %s1803_s9, %s1797_s25 }
 0x575   : > { %p1800_p11 = pneg %p1799_p9  ;;  %p1806_p0 = por %p1805_p8, %p1804_p3 }
 0x577   : > { %p1807_p2 = pnand %p1806_p0, %p1800_p11 }
 0x61a   : > { %v1087_v10 = vpop.f32.mrb[0].mxu1 }
 0x61b   : > { %1308 = vst.msk [vmem:[%s390_s15] sm:$0x1] %vm1307_vm9, %v1087_v10  ;;  %v1583_v11 = vpop.f32.mrb[1].mxu1 }
 0x622   : > { %v1159_v13 = vpop.f32.mrb[2].mxu1 }
 0x623   : > { %1309 = vst.msk [vmem:[%s390_s15 + $0x1] sm:$0x1] %vm1307_vm9, %v1159_v13  ;;  %v1590_v14 = vpop.f32.mrb[3].mxu1 }
 0x62a   : > { %v1231_v15 = vpop.f32.mrb[4].mxu1 }
 0x62b   : > { %1310 = vst.msk [vmem:[%s390_s15 + $0x2] sm:$0x1] %vm1307_vm9, %v1231_v15  ;;  %v1597_v16 = vpop.f32.mrb[5].mxu1 }
 0x632   : > { %v1303_v17 = vpop.f32.mrb[6].mxu1 }
 0x633   : > { %1311 = vst.msk [vmem:[%s390_s15 + $0x3] sm:$0x1] %vm1307_vm9, %v1303_v17  ;;  %v1604_v18 = vpop.f32.mrb[7].mxu1 }
 0x634   : > { %1810 = shalt.err (!%p1807_p2)
}
 0x635   : > { %s1811_s19 = scalar_lea.hbm %s2361_s14, 64  ;;  %s1815_s13 = scalar_lea.hbm %s2416_s8, 128 }
 0x636   : > { %p1812_p4 = scmp.ne.s32.totalorder %s2361_s14, %s1811_s19  ;;  %p1816_p1 = scmp.lt.u32.totalorder %s2361_s14, %s2416_s8 }
 0x637   : > { %p1817_p10 = scmp.lt.u32.totalorder %s1815_s13, %s1811_s19  ;;  %p1819_p7 = scmp.lt.u32.totalorder %s1811_s19, %s2361_s14 }
 0x638   : > { %p1813_p6 = pnand %p1812_p4, %p2437_p12 }
 0x639   : > { %p1818_p5 = por %p1817_p10, %p1816_p1 }
 0x63a   : > { %p1814_p13 = pneg %p1813_p6 }
 0x63b   : > { %p1820_p9 = por %p1819_p7, %p1818_p5 }
 0x63d   : > { %p1821_p11 = pnand %p1820_p9, %p1814_p13 }
 0x63f   : > { %1824 = shalt.err (!%p1821_p11)
}
 0x640   : > { %1630 = dma.vmem_to_hbm [thread:$0]  (%p2437_p12), %s2354_s20, 64, %s2361_s14, %s1318_s26, %s1882_s23, %s1882_s23, %s1883_s29  }
 0x641 PF: > { %s1362_s10 = sand.u32 1, %s1859_s27   ;;  %p2438_p3 = scmp.ne.s32.totalorder %s2429_s18, 0 }
 0x642   : > { %p2439_p8 = scmp.ge.s32.totalorder %s1871_s30, 2  ;;  %s1363_s25 = scalar_lea.sflag [#allocation4], %s1362_s10 }
 0x644   : > { %p1641_p0 = pnand %p2439_p8, %p2438_p3 }
 0x646   : > { %1850 = dma.done.wait (!%p1641_p0), %s1363_s25, 64  }
 0x647   : > { %1852 = vsyncadd (!%p1641_p0), %s1363_s25, 4294967232  ;;  %s1372_s17 = scalar_lea.sflag [#allocation9], %s1362_s10 }
 0x648   : > { %1854 = dma.done.wait (!%p1641_p0), %s1372_s17, 64  }
 0x649   : > { %1856 = vsyncadd (!%p1641_p0), %s1372_s17, 4294967232  ;;  %s2440_s22 = sld [smem:[#allocation14_spill]]  ;;  %s2441_s29 = sld [smem:[#allocation15_spill]] }
 0x64a   : > { %p28_p12 = scmp.ge.s32.totalorder %s1955_s11, 4   ;;  %s2442_s27 = smov %s1863_s28 }
 0x64b   : > { %s2444_s30 = smov %s1955_s11 }
 0x64c   :  { %30 = sbr.rel (!%p28_p12) target bundleno = 11 (0xb), region = 126 }
 0x64f   : > { %s2443_s28 = smov %s2440_s22 }
 0x653   :  { %1377 = vsyncpa [#allocation3], 1 }
 0x654   :  { %1379 = vsyncpa [#allocation3 + $0x1], 1 }
 0x655   :  { %1380 = vsyncpa [#allocation6], 1 }
 0x656   :  { %1382 = vsyncpa [#allocation6 + $0x1], 1 }
 0x657   :  { %1383 = vsyncpa [#allocation4], 1 }
 0x658   :  { %1385 = vsyncpa [#allocation4 + $0x1], 1 }
 0x659   :  { %1386 = vsyncpa [#allocation9], 1 }
 0x65a   :  { %1388 = vsyncpa [#allocation9 + $0x1], 1 }

</bundles_post_ra>
